<compile_context>
chip_gen: v7x
topology: tpu7x:2x2x1
jax: 0.10.0
libtpu: 0.0.40
codegen_flags: <defaults>
</compile_context>

<pallas_src>
import functools

import jax
import jax.numpy as jnp
from jax import lax
from jax.experimental import pallas as pl
from jax.experimental.pallas import tpu as pltpu


def _mse_kernel(x_ref, y_ref, o_ref, acc_ref, *, rows, tile_rows, lanes,
                blocks_per_split, blocks_total, needs_mask):
    c = pl.program_id(0)   # parallel axis (v7x: split across TensorCores)
    k = pl.program_id(1)   # sequential reduction axis within a split

    @pl.when(k == 0)
    def _():
        acc_ref[...] = jnp.zeros_like(acc_ref)

    d = x_ref[...].astype(jnp.float32) - y_ref[...].astype(jnp.float32)
    sq = d * d

    if needs_mask:
        # Logical block index (may point past the array for the phantom block
        # created by an uneven 2-way split; its mask is then all-False).
        block_idx = c * blocks_per_split + k

        @pl.when(block_idx < blocks_total - 1)
        def _():
            # Steady state: pure VPU, single-vreg accumulator RMW.
            acc_ref[...] += sq.reshape(tile_rows // 8, 8, lanes).sum(axis=0)

        @pl.when(block_idx >= blocks_total - 1)
        def _():
            # Last (possibly partial) real block and any phantom block: mask
            # rows past the true row count so unspecified padding / duplicated
            # data contributes exactly zero.
            row_ids = (lax.broadcasted_iota(jnp.int32, (tile_rows, lanes), 0)
                       + block_idx * tile_rows)
            masked = jnp.where(row_ids < rows, sq, jnp.float32(0.0))
            acc_ref[...] += masked.reshape(tile_rows // 8, 8, lanes).sum(axis=0)
    else:
        acc_ref[...] += sq.reshape(tile_rows // 8, 8, lanes).sum(axis=0)

    # One cheap (8,128) cross-lane reduce + vector->SMEM scalar store per split.
    @pl.when(k == pl.num_programs(1) - 1)
    def _():
        o_ref[0, 0] = jnp.sum(acc_ref[...])


def mse_pallas(x, y, *, tile_rows=2048, lanes=128):
    """mean((x - y)**2) over all elements, computed in a Pallas TPU kernel."""
    assert x.shape == y.shape, "MSELoss(reduction='none') requires matching shapes"
    total = int(x.size)
    if total == 0:
        return jnp.float32(0.0)

    xf = x.reshape(-1)
    yf = y.reshape(-1)

    rows = total // lanes
    tail = total - rows * lanes

    # Tail (<=127 elements): tiny wrapper-side jnp compute instead of padding
    # (jnp.pad would copy both full inputs -> ~2x HBM traffic).
    if tail:
        xt = xf[rows * lanes:].astype(jnp.float32)
        yt = yf[rows * lanes:].astype(jnp.float32)
        tail_sum = jnp.sum((xt - yt) ** 2)
    else:
        tail_sum = jnp.float32(0.0)

    if rows == 0:
        return tail_sum / jnp.float32(total)

    if tail:
        xm = xf[: rows * lanes].reshape(rows, lanes)
        ym = yf[: rows * lanes].reshape(rows, lanes)
    else:
        xm = xf.reshape(rows, lanes)   # metadata-only reshape
        ym = yf.reshape(rows, lanes)

    # Effective tile: multiple of 8 sublanes, never bigger than needed.
    tr = min(tile_rows, ((rows + 7) // 8) * 8)
    blocks_total = pl.cdiv(rows, tr)

    # Always 2-way split when there is more than one block (keeps both v7x
    # TensorCores pulling HBM even for odd block counts); physical block index
    # is clamped in the index_map, the phantom block is masked to zero.
    num_splits = 2 if blocks_total >= 2 else 1
    bps = pl.cdiv(blocks_total, num_splits)

    # Mask path only emitted when statically required.
    needs_mask = (rows % tr != 0) or (num_splits * bps != blocks_total)

    kernel = functools.partial(
        _mse_kernel, rows=rows, tile_rows=tr, lanes=lanes,
        blocks_per_split=bps, blocks_total=blocks_total, needs_mask=needs_mask)

    def in_map(c, k):
        return (jnp.minimum(c * bps + k, blocks_total - 1), 0)

    in_bytes = 2 * rows * lanes * x.dtype.itemsize
    partials = pl.pallas_call(
        kernel,
        out_shape=jax.ShapeDtypeStruct((num_splits, 1), jnp.float32),
        grid_spec=pltpu.PrefetchScalarGridSpec(
            num_scalar_prefetch=0,
            grid=(num_splits, bps),
            in_specs=[
                pl.BlockSpec((tr, lanes), in_map),
                pl.BlockSpec((tr, lanes), in_map),
            ],
            out_specs=pl.BlockSpec((1, 1), lambda c, k: (c, 0),
                                   memory_space=pltpu.SMEM),
            scratch_shapes=[pltpu.VMEM((8, lanes), jnp.float32)],
        ),
        compiler_params=pltpu.CompilerParams(
            dimension_semantics=("parallel", "arbitrary"),
        ),
        cost_estimate=pl.CostEstimate(
            flops=3 * rows * lanes,
            transcendentals=0,
            bytes_accessed=in_bytes + 4 * num_splits,
        ),
    )(xm, ym)

    # Tiny wrapper-side finish: per-split partials + tail, divide by count.
    return (jnp.sum(partials) + tail_sum) / jnp.float32(total)


# TODO(synk): SSIM / MS-SSIM branches of Distortion (grouped Gaussian conv2d
# pipelines) are not implemented; this kernel covers the MSE metric path.


if __name__ == "__main__":
    key = jax.random.PRNGKey(0)
    kx, ky = jax.random.split(key)

    # Primary case: small NCHW batch, clean lane-dense layout (no mask, no tail).
    X = jax.random.normal(kx, (2, 4, 16, 16), dtype=jnp.float32)
    Y = jax.random.normal(ky, (2, 4, 16, 16), dtype=jnp.float32)
    out = mse_pallas(X, Y)
    jax.block_until_ready(out)
    ref = jnp.mean((X - Y) ** 2)
    assert jnp.allclose(out, ref, rtol=1e-5, atol=1e-6), (out, ref)

    # Uneven blocking: partial last block + phantom block from the 2-way split.
    X2 = jax.random.normal(kx, (2, 4, 32, 32), dtype=jnp.float32)
    Y2 = jax.random.normal(ky, (2, 4, 32, 32), dtype=jnp.float32)
    out2 = mse_pallas(X2, Y2, tile_rows=24)
    jax.block_until_ready(out2)
    ref2 = jnp.mean((X2 - Y2) ** 2)
    assert jnp.allclose(out2, ref2, rtol=1e-5, atol=1e-6), (out2, ref2)

    # Non-multiple-of-128 element count: kernel + wrapper-side tail.
    X3 = jax.random.normal(kx, (3, 3, 11, 11), dtype=jnp.float32)
    Y3 = jax.random.normal(ky, (3, 3, 11, 11), dtype=jnp.float32)
    out3 = mse_pallas(X3, Y3)
    jax.block_until_ready(out3)
    ref3 = jnp.mean((X3 - Y3) ** 2)
    assert jnp.allclose(out3, ref3, rtol=1e-5, atol=1e-6), (out3, ref3)

    print("KERNEL_OK")
</pallas_src>

<mosaic_0001>
module attributes {stable_mosaic.version = 11 : i64} {
  func.func @_mse_kernel(%arg0: i32, %arg1: i32, %arg2: memref<16x128xf32, #tpu.memory_space<vmem>>, %arg3: memref<16x128xf32, #tpu.memory_space<vmem>>, %arg4: memref<1x1xf32, #tpu.memory_space<smem>>, %arg5: memref<8x128xf32, #tpu.memory_space<vmem>>) attributes {dimension_semantics = [#tpu.dimension_semantics<parallel>, #tpu.dimension_semantics<arbitrary>], iteration_bounds = array<i64: 1, 1>, scalar_prefetch = 0 : i64, scratch_operands = 1 : i64, tpu.core_type = #tpu.core_type<tc>, window_params = [{transform_indices = @transform_0, window_bounds = array<i64: 16, 128>}, {transform_indices = @transform_1, window_bounds = array<i64: 16, 128>}, {transform_indices = @transform_2, window_bounds = array<i64: 1, 1>}]} {
    %c0_i32 = arith.constant 0 : i32
    %0 = arith.cmpi eq, %arg1, %c0_i32 : i32
    %1 = arith.extui %0 : i1 to i32
    %c0_i32_0 = arith.constant 0 : i32
    %2 = arith.cmpi ne, %1, %c0_i32_0 : i32
    scf.if %2 {
      %cst_10 = arith.constant 0.000000e+00 : f32
      %15 = vector.broadcast %cst_10 : f32 to vector<8x128xf32>
      %c0_11 = arith.constant 0 : index
      %c0_12 = arith.constant 0 : index
      %16 = vector.load %arg5[%c0_11, %c0_12] : memref<8x128xf32, #tpu.memory_space<vmem>>, vector<8x128xf32>
      tpu.vector_store %arg5[%c0_11, %c0_12], %15 {strides = array<i32>} : memref<8x128xf32, #tpu.memory_space<vmem>>, vector<8x128xf32>,
    } else {
    }
    %c0 = arith.constant 0 : index
    %c0_1 = arith.constant 0 : index
    %3 = vector.load %arg2[%c0, %c0_1] : memref<16x128xf32, #tpu.memory_space<vmem>>, vector<16x128xf32>
    %c0_2 = arith.constant 0 : index
    %c0_3 = arith.constant 0 : index
    %4 = vector.load %arg3[%c0_2, %c0_3] : memref<16x128xf32, #tpu.memory_space<vmem>>, vector<16x128xf32>
    %5 = arith.subf %3, %4 : vector<16x128xf32>
    %6 = arith.mulf %5, %5 : vector<16x128xf32>
    %c0_4 = arith.constant 0 : index
    %c0_5 = arith.constant 0 : index
    %7 = vector.load %arg5[%c0_4, %c0_5] : memref<8x128xf32, #tpu.memory_space<vmem>>, vector<8x128xf32>
    %8 = vector.shape_cast %6 : vector<16x128xf32> to vector<2x8x128xf32>
    %cst = arith.constant dense<0.000000e+00> : vector<8x128xf32>
    %9 = vector.multi_reduction <add>, %8, %cst [0] : vector<2x8x128xf32> to vector<8x128xf32>
    %10 = arith.addf %7, %9 : vector<8x128xf32>
    %c0_6 = arith.constant 0 : index
    %c0_7 = arith.constant 0 : index
    %11 = vector.load %arg5[%c0_6, %c0_7] : memref<8x128xf32, #tpu.memory_space<vmem>>, vector<8x128xf32>
    tpu.vector_store %arg5[%c0_6, %c0_7], %10 {strides = array<i32>} : memref<8x128xf32, #tpu.memory_space<vmem>>, vector<8x128xf32>,
    %c0_i32_8 = arith.constant 0 : i32
    %12 = arith.cmpi eq, %arg1, %c0_i32_8 : i32
    %13 = arith.extui %12 : i1 to i32
    %c0_i32_9 = arith.constant 0 : i32
    %14 = arith.cmpi ne, %13, %c0_i32_9 : i32
    scf.if %14 {
      %c0_10 = arith.constant 0 : index
      %c0_11 = arith.constant 0 : index
      %15 = vector.load %arg5[%c0_10, %c0_11] : memref<8x128xf32, #tpu.memory_space<vmem>>, vector<8x128xf32>
      %16 = vector.shape_cast %15 : vector<8x128xf32> to vector<1x8x128xf32>
      %cst_12 = arith.constant dense<0.000000e+00> : vector<1xf32>
      %17 = vector.multi_reduction <add>, %16, %cst_12 [1, 2] : vector<1x8x128xf32> to vector<1xf32>
      %18 = vector.shape_cast %17 : vector<1xf32> to vector<1x1x1xf32>
      %19 = vector.extract %18[0, 0, 0] : f32 from vector<1x1x1xf32>
      %c0_13 = arith.constant 0 : index
      %c0_14 = arith.constant 0 : index
      %20 = memref.load %arg4[%c0_13, %c0_14] : memref<1x1xf32, #tpu.memory_space<smem>>
      memref.store %19, %arg4[%c0_13, %c0_14] : memref<1x1xf32, #tpu.memory_space<smem>>
    } else {
    }
    return
  }
  func.func @transform_0(%arg0: i32, %arg1: i32) -> (i32, i32) {
    %c1_i32 = arith.constant 1 : i32
    %0 = arith.muli %arg0, %c1_i32 : i32
    %1 = arith.addi %0, %arg1 : i32
    %c0_i32 = arith.constant 0 : i32
    %2 = arith.minsi %1, %c0_i32 : i32
    %c0_i32_0 = arith.constant 0 : i32
    %c0_i32_1 = arith.constant 0 : i32
    return %2, %c0_i32_0 : i32, i32
  }
  func.func @transform_1(%arg0: i32, %arg1: i32) -> (i32, i32) {
    %c1_i32 = arith.constant 1 : i32
    %0 = arith.muli %arg0, %c1_i32 : i32
    %1 = arith.addi %0, %arg1 : i32
    %c0_i32 = arith.constant 0 : i32
    %2 = arith.minsi %1, %c0_i32 : i32
    %c0_i32_0 = arith.constant 0 : i32
    %c0_i32_1 = arith.constant 0 : i32
    return %2, %c0_i32_0 : i32, i32
  }
  func.func @transform_2(%arg0: i32, %arg1: i32) -> (i32, i32) {
    %c0_i32 = arith.constant 0 : i32
    %c0_i32_0 = arith.constant 0 : i32
    return %arg0, %c0_i32 : i32, i32
  }
}

</mosaic_0001>

<bundles_post_ra>
// kernel: tpu_custom_call.1
= control target key start
LH: loop header
LB: loop body
LE: loop exit
PB: predicated region body
PF: predicated region fallthrough
CT: control target
= control target key end

     0   :  { %7 = vsyncpa [#allocation4], 0  ;;  %s234_s0 = inlined_call_operand.hbm [shape: f32[16,128], index: 0, kind: input, shape index: {}]   ;;  %s235_s1 = inlined_call_operand.hbm [shape: f32[16,128], index: 1, kind: input, shape index: {}]   ;;  %s236_s2 = inlined_call_operand.hbm [shape: f32[1,1], index: 2, kind: output, shape index: {}]  }
   0x1   :  { %8 = vsyncpa [#allocation7], 0 }
   0x2   :  { %9 = vsyncpa [#allocation5], 0  ;;  %s178_s9 = smov [#allocation3]   ;;  %s118_s13 = scalar_lea.hbm %s234_s0, 256 }
   0x3   :  { %s21_s10 = sshll.u32 %s178_s9, 4  ;;  %p119_p0 = scmp.ne.s32.totalorder %s234_s0, %s118_s13  ;;  %s22_s10 = int_to_ptr.vmem [resolvable:$true] %s21_s10 }
   0x4   :  { %p122_p1 = scmp.lt.u32.totalorder %s118_s13, %s234_s0 }
   0x6   :  { %p124_p2 = pnand %p122_p1, %p119_p0 }
   0x8   :  { %127 = shalt.err (!%p124_p2)
}
   0x9   :  { %s128_s18 = scalar_lea.vmem %s22_s10, 256  ;;  %p133_p4 = scmp.lt.s32.totalorder %s22_s10, %s22_s10 }
   0xa   :  { %p129_p3 = scmp.ne.s32.totalorder %s22_s10, %s128_s18  ;;  %p134_p5 = scmp.lt.s32.totalorder %s128_s18, %s128_s18 }
   0xc   :  { %p135_p6 = por %p134_p5, %p133_p4 }
   0xe   :  { %p136_p7 = pnand %p135_p6, %p129_p3 }
  0x10   :  { %139 = shalt.err (!%p136_p7)
}
  0x11   :  { %s179_s19 = smov 128   ;;  %s180_s20 = smov 8  }
  0x12   :  { %27 = dma.hbm_to_vmem [thread:$0]  %s234_s0, 256, %s22_s10, [#allocation4], %s179_s19, %s179_s19, %s180_s20  }
  0x13   :  { %s181_s23 = smov [#allocation6]   ;;  %s140_s27 = scalar_lea.hbm %s235_s1, 256 }
  0x14   :  { %s39_s24 = sshll.u32 %s181_s23, 4  ;;  %p141_p8 = scmp.ne.s32.totalorder %s235_s1, %s140_s27  ;;  %s40_s24 = int_to_ptr.vmem [resolvable:$true] %s39_s24 }
  0x15   :  { %p144_p9 = scmp.lt.u32.totalorder %s140_s27, %s235_s1 }
  0x17   :  { %p146_p10 = pnand %p144_p9, %p141_p8 }
  0x19   :  { %149 = shalt.err (!%p146_p10)
}
  0x1a   :  { %s150_s4 = scalar_lea.vmem %s40_s24, 256  ;;  %p155_p12 = scmp.lt.s32.totalorder %s40_s24, %s40_s24 }
  0x1b   :  { %p151_p11 = scmp.ne.s32.totalorder %s40_s24, %s150_s4  ;;  %p156_p13 = scmp.lt.s32.totalorder %s150_s4, %s150_s4 }
  0x1d   :  { %p157_p0 = por %p156_p13, %p155_p12 }
  0x1f   :  { %p158_p1 = pnand %p157_p0, %p151_p11 }
  0x21   :  { %161 = shalt.err (!%p158_p1)
}
  0x22   :  { %45 = dma.hbm_to_vmem [thread:$0]  %s235_s1, 256, %s40_s24, [#allocation7], %s179_s19, %s179_s19, %s180_s20  }
  0x23   :  { %172 = dma.done.wait [#allocation4], 256  }
  0x24   :  { %173 = vsyncadd [#allocation4], 4294967040 }
  0x25   :  { %174 = dma.done.wait [#allocation7], 256  }
  0x26   :  { %175 = vsyncadd [#allocation7], 4294967040  ;;  %v65_v0 = vld [vmem:[#allocation3] sm:$0xff]  ;;  %v66_v1 = vld [vmem:[#allocation3 + $0x8] sm:$0xff]  ;;  %s162_s8 = scalar_lea.hbm %s236_s2, 16 }
  0x27   :  { %v67_v2 = vld [vmem:[#allocation6] sm:$0xff]  ;;  %v68_v3 = vld [vmem:[#allocation6 + $0x8] sm:$0xff]  ;;  %p163_p2 = scmp.ne.s32.totalorder %s236_s2, %s162_s8  ;;  %p166_p3 = scmp.lt.u32.totalorder %s162_s8, %s236_s2 }
  0x28   :  { %v69_v4 = vsub.f32 %v65_v0, %v67_v2  ;;  %v70_v5 = vsub.f32 %v66_v1, %v68_v3 }
  0x29   :  { %p168_p4 = pnand %p166_p3, %p163_p2 }
  0x2a   :  { %v71_v6 = vmul.f32 %v69_v4, %v69_v4  ;;  %v72_v7 = vmul.f32 %v70_v5, %v70_v5 }
  0x2c   :  { %v74_v8 = vadd.f32 %v72_v7, %v71_v6 }
  0x2e   :  { %81 = vadd.xlane.f32.xlu0 %v74_v8 }
  0xbb   :  { %v82_v9 = vpop.xlane.xlu0 %81 }
  0xbc   :  { %v83_v10 = vrot.slane %v82_v9, 4 }
  0xbe   :  { %v84_v11 = vadd.f32 %v83_v10, %v82_v9 }
  0xc0   :  { %v85_v12 = vrot.slane %v84_v11, 2 }
  0xc2   :  { %v86_v13 = vadd.f32 %v85_v12, %v84_v11 }
  0xc4   :  { %v87_v14 = vrot.slane %v86_v13, 1 }
  0xc6   :  { %v88_v15 = vadd.f32 %v87_v14, %v86_v13 }
  0xc8   :  { %111 = vpush %v88_v15 }
  0xf9   :  { %s112_s1 = spop %111 }
  0xfa   :  { %91 = sst [smem:[#allocation8]] %s112_s1 }
  0xfb   :  { %171 = shalt.err (!%p168_p4)
}
  0xfc   :  { %s182_s13 = smov [#allocation8]  }
  0xfd   :  { %99 = dma.smem_to_hbm %s182_s13, 16, %s236_s2, [#allocation5]  }
  0xfe   :  { %176 = dma.done.wait [#allocation5], 16  }
  0xff   :  { %177 = vsyncadd [#allocation5], 4294967280 }
 0x100   :  { %103 = sfence }
 0x101   :  { %104 = vsyncpa [#allocation4], 1 }
 0x102   :  { %105 = vsyncpa [#allocation7], 1 }
 0x103   :  { %106 = vsyncpa [#allocation5], 1 }

</bundles_post_ra>
